<compile_context>
chip_gen: v7x
topology: tpu7x:2x2x1
jax: 0.10.0
libtpu: 0.0.40
codegen_flags: <defaults>
</compile_context>

<pallas_src>
import jax
import jax.numpy as jnp
import numpy as np
from jax import lax
from jax.experimental import pallas as pl
from jax.experimental.pallas import tpu as pltpu


def _double_conv_kernel(x_ref, w1_ref, b1_ref, w2_ref, b2_ref, o_ref):
    """Block shapes:
      x_ref  : (B, H, W*Cin_p)            f32 (lane-dense, Cin zero-padded)
      w1_ref : (3*W*Cin_p,  W*Cmid)       compute dtype, BN1 scale folded in
      w2_ref : (3*W*Cmid,   W*Cout)       compute dtype, BN2 scale folded in
      b1/b2  : (1, W*C)                   f32 folded BN shift (per lane)
      o_ref  : (B, H, W*Cout)             f32, lane-dense
    """
    B, H, _ = x_ref.shape
    M = B * H
    cdt = w1_ref.dtype  # matmul operand dtype; accumulation is always f32

    # Hoisted border masks, (M, 1): first/last row of each image in the block.
    rows = lax.broadcasted_iota(jnp.int32, (M, 1), 0)
    not_top = (rows % H) != 0
    not_bot = (rows % H) != (H - 1)

    def conv_bn_relu(v32, w_ref, b_ref):
        # v32: (M, W*Ci) f32.  Vertical taps via sublane rolls (XLU) + masks;
        # horizontal taps + padding live in the banded weights.  The three dy
        # operands are K-stacked along lanes -> a single MXU matmul.
        up = jnp.where(not_top, pltpu.roll(v32, shift=1, axis=0), 0.0)
        down = jnp.where(not_bot, pltpu.roll(v32, shift=M - 1, axis=0), 0.0)
        stacked = jnp.concatenate([up, v32, down], axis=-1)   # (M, 3*W*Ci)
        acc = jnp.dot(stacked.astype(cdt), w_ref[...],
                      preferred_element_type=jnp.float32)     # (M, W*Co) f32
        # Folded BN shift (scale already in the weights) + ReLU, in f32.
        return jnp.maximum(acc + b_ref[...], 0.0)

    x32 = x_ref[...].reshape(M, -1)                    # (M, W*Cin_p) f32
    y1 = conv_bn_relu(x32, w1_ref, b1_ref)             # (M, W*Cmid) f32
    y2 = conv_bn_relu(y1, w2_ref, b2_ref)              # (M, W*Cout) f32
    o_ref[...] = y2.reshape(B, H, -1).astype(o_ref.dtype)


def _banded_conv_weights(w_oihw, width, col_scale=None):
    """OIHW (Co, Ci, 3, 3) -> K-stacked banded matrix (3*width*Ci, width*Co).

    Row index = dy*(W*Ci) + wi*Ci + ci, column = wo*Co + co, with
      B[dy, wi*Ci+ci, wo*Co+co] = w[co, ci, dy, wi - wo + 1] * col_scale[co]
    for 0 <= wi - wo + 1 < 3, else 0.  Horizontal padding=1 is implicit;
    vertical padding is handled in the kernel via rolls + border masks.
    """
    co_, ci_, kh, kw = w_oihw.shape
    w_hwio = jnp.transpose(w_oihw, (2, 3, 1, 0)).astype(jnp.float32)  # (3,3,Ci,Co)
    if col_scale is not None:
        w_hwio = w_hwio * col_scale.reshape(1, 1, 1, co_).astype(jnp.float32)
    wi = jnp.arange(width)[:, None]
    wo = jnp.arange(width)[None, :]
    delta = wi - wo + 1                                   # (W, W)
    valid = (delta >= 0) & (delta < kw)
    dsafe = jnp.clip(delta, 0, kw - 1)
    blocks = w_hwio[:, dsafe]                             # (3, W, W, Ci, Co)
    blocks = blocks * valid[None, :, :, None, None]
    return blocks.transpose(0, 1, 3, 2, 4).reshape(kh * width * ci_, width * co_)


def _pad_channels_for_lanes(c, width):
    """Smallest c_p >= c with (width * c_p) % 128 == 0 (lane-dense block)."""
    for cp in range(c, c + 129):
        if (width * cp) % 128 == 0:
            return cp
    return c


def _pick_batch_block(n, h, target_m=256):
    """Smallest divisor b of n with b*h >= target_m; else fold the full batch."""
    for b in range(1, n + 1):
        if n % b == 0 and b * h >= target_m:
            return b
    return n


def double_conv_pallas(x_nchw, w1_oihw, g1, be1, m1, v1,
                       w2_oihw, g2, be2, m2, v2, eps=1e-5,
                       compute_dtype=jnp.bfloat16, batch_block=None):
    """x_nchw: (N, Cin, H, W) float32.  Returns (N, Cout, H, W) float32."""
    N, Cin, H, W = x_nchw.shape
    Cmid = w1_oihw.shape[0]
    Cout = w2_oihw.shape[0]

    # Pad Cin so the conv1 input block is lane-dense (W*Cin_p % 128 == 0).
    Cin_p = _pad_channels_for_lanes(Cin, W)
    x = jnp.transpose(x_nchw, (0, 2, 3, 1))                 # (N, H, W, Cin)
    if Cin_p != Cin:
        x = jnp.pad(x, ((0, 0), (0, 0), (0, 0), (0, Cin_p - Cin)))
        w1_oihw = jnp.pad(w1_oihw, ((0, 0), (0, Cin_p - Cin), (0, 0), (0, 0)))
    x = x.reshape(N, H, W * Cin_p).astype(jnp.float32)      # lane axis = W*Cin_p

    # Eval-mode BN: fold scale into conv weight columns, keep shift per lane.
    s1 = g1 / jnp.sqrt(v1 + eps)
    s2 = g2 / jnp.sqrt(v2 + eps)
    w1 = _banded_conv_weights(w1_oihw, W, col_scale=s1).astype(compute_dtype)
    w2 = _banded_conv_weights(w2_oihw, W, col_scale=s2).astype(compute_dtype)
    b1 = jnp.tile(be1 - m1 * s1, W).reshape(1, W * Cmid).astype(jnp.float32)
    b2 = jnp.tile(be2 - m2 * s2, W).reshape(1, W * Cout).astype(jnp.float32)

    # Fold batch into the matmul M axis: B images per grid step.
    B = batch_block if batch_block is not None else _pick_batch_block(N, H)
    assert N % B == 0, (N, B)
    grid = (N // B,)

    def nbytes(shape, dtype):
        return int(np.prod(shape)) * jnp.dtype(dtype).itemsize

    block_bytes = (nbytes((B, H, W * Cin_p), jnp.float32)
                   + nbytes((3 * W * Cin_p, W * Cmid), compute_dtype)
                   + nbytes((3 * W * Cmid, W * Cout), compute_dtype)
                   + nbytes((1, W * Cmid), jnp.float32)
                   + nbytes((1, W * Cout), jnp.float32)
                   + nbytes((B, H, W * Cout), jnp.float32))
    # Derive the VMEM limit from the actual chip (v7x only has 64 MiB total);
    # double-buffered pipeline + headroom, clamped to 75% of capacity.
    try:
        vmem_cap = int(pltpu.get_tpu_info().vmem_capacity_bytes)
    except Exception:  # pragma: no cover - conservative fallback (v7x)
        vmem_cap = 64 << 20
    vmem_limit = int(min(max(4 * block_bytes, 8 << 20), (vmem_cap * 3) // 4))

    # True conv MACs (the banded matmul's structural zeros are not counted).
    flops = 2 * N * H * W * 9 * (Cin * Cmid + Cmid * Cout)
    bytes_accessed = (nbytes((N, H, W * Cin_p), jnp.float32)
                      + nbytes((3 * W * Cin_p, W * Cmid), compute_dtype)
                      + nbytes((3 * W * Cmid, W * Cout), compute_dtype)
                      + nbytes((N, H, W * Cout), jnp.float32))

    # Note: w1/b1/w2/b2 are grid-invariant; at these sizes (<0.5 MiB) the
    # default double-buffering is negligible, so no per-operand pipeline_mode.
    out = pl.pallas_call(
        _double_conv_kernel,
        out_shape=jax.ShapeDtypeStruct((N, H, W * Cout), jnp.float32),
        grid_spec=pltpu.PrefetchScalarGridSpec(
            num_scalar_prefetch=0,
            grid=grid,
            in_specs=[
                pl.BlockSpec((B, H, W * Cin_p), lambda n: (n, 0, 0)),
                pl.BlockSpec((3 * W * Cin_p, W * Cmid), lambda n: (0, 0)),
                pl.BlockSpec((1, W * Cmid), lambda n: (0, 0)),
                pl.BlockSpec((3 * W * Cmid, W * Cout), lambda n: (0, 0)),
                pl.BlockSpec((1, W * Cout), lambda n: (0, 0)),
            ],
            out_specs=pl.BlockSpec((B, H, W * Cout), lambda n: (n, 0, 0)),
        ),
        compiler_params=pltpu.CompilerParams(
            dimension_semantics=("parallel",),
            vmem_limit_bytes=vmem_limit),
        cost_estimate=pl.CostEstimate(
            flops=int(flops), transcendentals=0,
            bytes_accessed=int(bytes_accessed)),
    )(x, w1, b1, w2, b2)

    # (N, H, W*Cout) -> NCHW
    return jnp.transpose(out.reshape(N, H, W, Cout), (0, 3, 1, 2))


def double_conv_reference(x_nchw, w1_oihw, g1, be1, m1, v1,
                          w2_oihw, g2, be2, m2, v2, eps=1e-5):
    """Pure-JAX reference mirroring PyTorch (eval-mode BN)."""
    def conv(x, w):
        return lax.conv_general_dilated(
            x, w, window_strides=(1, 1), padding=((1, 1), (1, 1)),
            dimension_numbers=("NCHW", "OIHW", "NCHW"))

    def bn_relu(x, g, b, m, v):
        scale = (g / jnp.sqrt(v + eps)).reshape(1, -1, 1, 1)
        shift = (b - m * g / jnp.sqrt(v + eps)).reshape(1, -1, 1, 1)
        return jnp.maximum(x * scale + shift, 0.0)

    y = bn_relu(conv(x_nchw, w1_oihw), g1, be1, m1, v1)
    return bn_relu(conv(y, w2_oihw), g2, be2, m2, v2)


if __name__ == "__main__":
    # Small, deterministic example: DoubleConv(in_channels=4, out_channels=8)
    N, Cin, H, W = 2, 4, 16, 16
    Cmid = Cout = 8

    key = jax.random.PRNGKey(0)
    ks = jax.random.split(key, 11)
    x = jax.random.normal(ks[0], (N, Cin, H, W), jnp.float32)

    w1 = jax.random.normal(ks[1], (Cmid, Cin, 3, 3), jnp.float32) * 0.2
    g1 = jax.random.uniform(ks[2], (Cmid,), jnp.float32, 0.5, 1.5)
    be1 = jax.random.normal(ks[3], (Cmid,), jnp.float32) * 0.1
    m1 = jax.random.normal(ks[4], (Cmid,), jnp.float32) * 0.1
    v1 = jax.random.uniform(ks[5], (Cmid,), jnp.float32, 0.5, 1.5)

    w2 = jax.random.normal(ks[6], (Cout, Cmid, 3, 3), jnp.float32) * 0.2
    g2 = jax.random.uniform(ks[7], (Cout,), jnp.float32, 0.5, 1.5)
    be2 = jax.random.normal(ks[8], (Cout,), jnp.float32) * 0.1
    m2 = jax.random.normal(ks[9], (Cout,), jnp.float32) * 0.1
    v2 = jax.random.uniform(ks[10], (Cout,), jnp.float32, 0.5, 1.5)

    ref = jax.block_until_ready(double_conv_reference(
        x, w1, g1, be1, m1, v1, w2, g2, be2, m2, v2))

    # Default path: bf16 MXU operands, f32 accumulation + epilogue.
    out_bf16 = jax.block_until_ready(double_conv_pallas(
        x, w1, g1, be1, m1, v1, w2, g2, be2, m2, v2))
    assert out_bf16.shape == (N, Cout, H, W), out_bf16.shape
    np.testing.assert_allclose(np.asarray(out_bf16), np.asarray(ref),
                               atol=3e-1, rtol=1e-1)

    # f32-operand path: tight check of the eval-mode semantics.
    out_f32 = jax.block_until_ready(double_conv_pallas(
        x, w1, g1, be1, m1, v1, w2, g2, be2, m2, v2,
        compute_dtype=jnp.float32))
    np.testing.assert_allclose(np.asarray(out_f32), np.asarray(ref),
                               atol=1e-3, rtol=1e-3)

    print("KERNEL_OK")
</pallas_src>

<mosaic_0001>
module attributes {stable_mosaic.version = 11 : i64} {
  func.func @_double_conv_kernel(%arg0: i32, %arg1: memref<2x16x128xf32, #tpu.memory_space<vmem>>, %arg2: memref<384x128xbf16, #tpu.memory_space<vmem>>, %arg3: memref<1x128xf32, #tpu.memory_space<vmem>>, %arg4: memref<384x128xbf16, #tpu.memory_space<vmem>>, %arg5: memref<1x128xf32, #tpu.memory_space<vmem>>, %arg6: memref<2x16x128xf32, #tpu.memory_space<vmem>>) attributes {dimension_semantics = [#tpu.dimension_semantics<parallel>], iteration_bounds = array<i64: 1>, scalar_prefetch = 0 : i64, scratch_operands = 0 : i64, tpu.core_type = #tpu.core_type<tc>, window_params = [{transform_indices = @transform_0, window_bounds = array<i64: 2, 16, 128>}, {pipeline_mode = #tpu.pipeline_mode<synchronous>, transform_indices = @transform_1, window_bounds = array<i64: 384, 128>}, {pipeline_mode = #tpu.pipeline_mode<synchronous>, transform_indices = @transform_2, window_bounds = array<i64: 1, 128>}, {pipeline_mode = #tpu.pipeline_mode<synchronous>, transform_indices = @transform_3, window_bounds = array<i64: 384, 128>}, {pipeline_mode = #tpu.pipeline_mode<synchronous>, transform_indices = @transform_4, window_bounds = array<i64: 1, 128>}, {transform_indices = @transform_5, window_bounds = array<i64: 2, 16, 128>}]} {
    %0 = tpu.iota {dimensions = array<i32: 0>} : vector<32x1xi32>
    %c16_i32 = arith.constant 16 : i32
    %c0_i32 = arith.constant 0 : i32
    %1 = arith.cmpi eq, %c16_i32, %c0_i32 : i32
    %c1_i32 = arith.constant 1 : i32
    %2 = arith.select %1, %c1_i32, %c16_i32 : i32
    %3 = vector.broadcast %2 : i32 to vector<32x1xi32>
    %4 = arith.remsi %0, %3 : vector<32x1xi32>
    %c0_i32_0 = arith.constant 0 : i32
    %5 = vector.broadcast %c0_i32_0 : i32 to vector<32x1xi32>
    %6 = arith.cmpi ne, %4, %5 : vector<32x1xi32>
    %c0_i32_1 = arith.constant 0 : i32
    %7 = vector.broadcast %c0_i32_1 : i32 to vector<32x1xi32>
    %8 = arith.cmpi slt, %4, %7 : vector<32x1xi32>
    %c0_i32_2 = arith.constant 0 : i32
    %9 = arith.cmpi slt, %2, %c0_i32_2 : i32
    %10 = vector.broadcast %9 : i1 to vector<32x1xi1>
    %11 = vector.broadcast %10 : vector<32x1xi1> to vector<32x1xi1>
    %12 = arith.xori %8, %11 : vector<32x1xi1>
    %13 = arith.andi %12, %6 : vector<32x1xi1>
    %14 = vector.broadcast %2 : i32 to vector<32x1xi32>
    %15 = arith.addi %4, %14 : vector<32x1xi32>
    %16 = arith.select %13, %15, %4 : vector<32x1xi1>, vector<32x1xi32>
    %c0_i32_3 = arith.constant 0 : i32
    %17 = vector.broadcast %c0_i32_3 : i32 to vector<32x1xi32>
    %18 = arith.cmpi ne, %16, %17 : vector<32x1xi32>
    %c16_i32_4 = arith.constant 16 : i32
    %c0_i32_5 = arith.constant 0 : i32
    %19 = arith.cmpi eq, %c16_i32_4, %c0_i32_5 : i32
    %c1_i32_6 = arith.constant 1 : i32
    %20 = arith.select %19, %c1_i32_6, %c16_i32_4 : i32
    %21 = vector.broadcast %20 : i32 to vector<32x1xi32>
    %22 = arith.remsi %0, %21 : vector<32x1xi32>
    %c0_i32_7 = arith.constant 0 : i32
    %23 = vector.broadcast %c0_i32_7 : i32 to vector<32x1xi32>
    %24 = arith.cmpi ne, %22, %23 : vector<32x1xi32>
    %c0_i32_8 = arith.constant 0 : i32
    %25 = vector.broadcast %c0_i32_8 : i32 to vector<32x1xi32>
    %26 = arith.cmpi slt, %22, %25 : vector<32x1xi32>
    %c0_i32_9 = arith.constant 0 : i32
    %27 = arith.cmpi slt, %20, %c0_i32_9 : i32
    %28 = vector.broadcast %27 : i1 to vector<32x1xi1>
    %29 = vector.broadcast %28 : vector<32x1xi1> to vector<32x1xi1>
    %30 = arith.xori %26, %29 : vector<32x1xi1>
    %31 = arith.andi %30, %24 : vector<32x1xi1>
    %32 = vector.broadcast %20 : i32 to vector<32x1xi32>
    %33 = arith.addi %22, %32 : vector<32x1xi32>
    %34 = arith.select %31, %33, %22 : vector<32x1xi1>, vector<32x1xi32>
    %c15_i32 = arith.constant 15 : i32
    %35 = vector.broadcast %c15_i32 : i32 to vector<32x1xi32>
    %36 = arith.cmpi ne, %34, %35 : vector<32x1xi32>
    %c0 = arith.constant 0 : index
    %c0_10 = arith.constant 0 : index
    %c0_11 = arith.constant 0 : index
    %37 = vector.load %arg1[%c0, %c0_10, %c0_11] : memref<2x16x128xf32, #tpu.memory_space<vmem>>, vector<2x16x128xf32>
    %38 = vector.shape_cast %37 : vector<2x16x128xf32> to vector<32x128xf32>
    %c1_i32_12 = arith.constant 1 : i32
    %39 = tpu.dynamic_rotate %38 by %c1_i32_12 dim 0 : vector<32x128xf32>, i32 -> vector<32x128xf32>
    %cst = arith.constant 0.000000e+00 : f32
    %40 = vector.shape_cast %18 : vector<32x1xi1> to vector<32x1xi1>
    %41 = vector.broadcast %40 : vector<32x1xi1> to vector<32x128xi1>
    %42 = vector.broadcast %cst : f32 to vector<32x128xf32>
    %43 = arith.select %41, %39, %42 : vector<32x128xi1>, vector<32x128xf32>
    %c31_i32 = arith.constant 31 : i32
    %44 = tpu.dynamic_rotate %38 by %c31_i32 dim 0 : vector<32x128xf32>, i32 -> vector<32x128xf32>
    %cst_13 = arith.constant 0.000000e+00 : f32
    %45 = vector.shape_cast %36 : vector<32x1xi1> to vector<32x1xi1>
    %46 = vector.broadcast %45 : vector<32x1xi1> to vector<32x128xi1>
    %47 = vector.broadcast %cst_13 : f32 to vector<32x128xf32>
    %48 = arith.select %46, %44, %47 : vector<32x128xi1>, vector<32x128xf32>
    %49 = tpu.concatenate %43, %38, %48 in 1 : vector<32x128xf32>, vector<32x128xf32>, vector<32x128xf32> -> vector<32x384xf32>
    %50 = arith.truncf %49 : vector<32x384xf32> to vector<32x384xbf16>
    %c0_14 = arith.constant 0 : index
    %c0_15 = arith.constant 0 : index
    %51 = vector.load %arg2[%c0_14, %c0_15] : memref<384x128xbf16, #tpu.memory_space<vmem>>, vector<384x128xbf16>
    %cst_16 = arith.constant dense<0.000000e+00> : vector<32x128xf32>
    %52 = tpu.matmul %50, %51, %cst_16 {dimension_numbers = #tpu.dot_dimension_numbers<[1], [0], [0], [1], [0, 0, 1, 1], [], []>} : vector<32x384xbf16>, vector<384x128xbf16>, vector<32x128xf32> -> vector<32x128xf32>
    %c0_17 = arith.constant 0 : index
    %c0_18 = arith.constant 0 : index
    %53 = vector.load %arg3[%c0_17, %c0_18] : memref<1x128xf32, #tpu.memory_space<vmem>>, vector<1x128xf32>
    %54 = vector.broadcast %53 : vector<1x128xf32> to vector<32x128xf32>
    %55 = arith.addf %52, %54 : vector<32x128xf32>
    %cst_19 = arith.constant 0.000000e+00 : f32
    %56 = vector.broadcast %cst_19 : f32 to vector<32x128xf32>
    %57 = arith.maximumf %55, %56 : vector<32x128xf32>
    %c1_i32_20 = arith.constant 1 : i32
    %58 = tpu.dynamic_rotate %57 by %c1_i32_20 dim 0 : vector<32x128xf32>, i32 -> vector<32x128xf32>
    %cst_21 = arith.constant 0.000000e+00 : f32
    %59 = vector.shape_cast %18 : vector<32x1xi1> to vector<32x1xi1>
    %60 = vector.broadcast %59 : vector<32x1xi1> to vector<32x128xi1>
    %61 = vector.broadcast %cst_21 : f32 to vector<32x128xf32>
    %62 = arith.select %60, %58, %61 : vector<32x128xi1>, vector<32x128xf32>
    %c31_i32_22 = arith.constant 31 : i32
    %63 = tpu.dynamic_rotate %57 by %c31_i32_22 dim 0 : vector<32x128xf32>, i32 -> vector<32x128xf32>
    %cst_23 = arith.constant 0.000000e+00 : f32
    %64 = vector.shape_cast %36 : vector<32x1xi1> to vector<32x1xi1>
    %65 = vector.broadcast %64 : vector<32x1xi1> to vector<32x128xi1>
    %66 = vector.broadcast %cst_23 : f32 to vector<32x128xf32>
    %67 = arith.select %65, %63, %66 : vector<32x128xi1>, vector<32x128xf32>
    %68 = tpu.concatenate %62, %57, %67 in 1 : vector<32x128xf32>, vector<32x128xf32>, vector<32x128xf32> -> vector<32x384xf32>
    %69 = arith.truncf %68 : vector<32x384xf32> to vector<32x384xbf16>
    %c0_24 = arith.constant 0 : index
    %c0_25 = arith.constant 0 : index
    %70 = vector.load %arg4[%c0_24, %c0_25] : memref<384x128xbf16, #tpu.memory_space<vmem>>, vector<384x128xbf16>
    %cst_26 = arith.constant dense<0.000000e+00> : vector<32x128xf32>
    %71 = tpu.matmul %69, %70, %cst_26 {dimension_numbers = #tpu.dot_dimension_numbers<[1], [0], [0], [1], [0, 0, 1, 1], [], []>} : vector<32x384xbf16>, vector<384x128xbf16>, vector<32x128xf32> -> vector<32x128xf32>
    %c0_27 = arith.constant 0 : index
    %c0_28 = arith.constant 0 : index
    %72 = vector.load %arg5[%c0_27, %c0_28] : memref<1x128xf32, #tpu.memory_space<vmem>>, vector<1x128xf32>
    %73 = vector.broadcast %72 : vector<1x128xf32> to vector<32x128xf32>
    %74 = arith.addf %71, %73 : vector<32x128xf32>
    %cst_29 = arith.constant 0.000000e+00 : f32
    %75 = vector.broadcast %cst_29 : f32 to vector<32x128xf32>
    %76 = arith.maximumf %74, %75 : vector<32x128xf32>
    %77 = vector.shape_cast %76 : vector<32x128xf32> to vector<2x16x128xf32>
    %c0_30 = arith.constant 0 : index
    %c0_31 = arith.constant 0 : index
    %c0_32 = arith.constant 0 : index
    %78 = vector.load %arg6[%c0_30, %c0_31, %c0_32] : memref<2x16x128xf32, #tpu.memory_space<vmem>>, vector<2x16x128xf32>
    tpu.vector_store %arg6[%c0_30, %c0_31, %c0_32], %77 {strides = array<i32>} : memref<2x16x128xf32, #tpu.memory_space<vmem>>, vector<2x16x128xf32>,
    return
  }
  func.func @transform_0(%arg0: i32) -> (i32, i32, i32) {
    %c0_i32 = arith.constant 0 : i32
    %c0_i32_0 = arith.constant 0 : i32
    %c0_i32_1 = arith.constant 0 : i32
    return %arg0, %c0_i32, %c0_i32_0 : i32, i32, i32
  }
  func.func @transform_1(%arg0: i32) -> (i32, i32) {
    %c0_i32 = arith.constant 0 : i32
    %c0_i32_0 = arith.constant 0 : i32
    %c0_i32_1 = arith.constant 0 : i32
    return %c0_i32, %c0_i32_0 : i32, i32
  }
  func.func @transform_2(%arg0: i32) -> (i32, i32) {
    %c0_i32 = arith.constant 0 : i32
    %c0_i32_0 = arith.constant 0 : i32
    %c0_i32_1 = arith.constant 0 : i32
    return %c0_i32, %c0_i32_0 : i32, i32
  }
  func.func @transform_3(%arg0: i32) -> (i32, i32) {
    %c0_i32 = arith.constant 0 : i32
    %c0_i32_0 = arith.constant 0 : i32
    %c0_i32_1 = arith.constant 0 : i32
    return %c0_i32, %c0_i32_0 : i32, i32
  }
  func.func @transform_4(%arg0: i32) -> (i32, i32) {
    %c0_i32 = arith.constant 0 : i32
    %c0_i32_0 = arith.constant 0 : i32
    %c0_i32_1 = arith.constant 0 : i32
    return %c0_i32, %c0_i32_0 : i32, i32
  }
  func.func @transform_5(%arg0: i32) -> (i32, i32, i32) {
    %c0_i32 = arith.constant 0 : i32
    %c0_i32_0 = arith.constant 0 : i32
    %c0_i32_1 = arith.constant 0 : i32
    return %arg0, %c0_i32, %c0_i32_0 : i32, i32, i32
  }
}

</mosaic_0001>

<bundles_post_ra>
// kernel: tpu_custom_call.1
= control target key start
LH: loop header
LB: loop body
LE: loop exit
PB: predicated region body
PF: predicated region fallthrough
CT: control target
= control target key end

     0   :  { %10 = vsyncpa [#allocation3], 0  ;;  %s1370_s0 = inlined_call_operand.hbm [shape: f32[2,16,128], index: 0, kind: input, shape index: {}]   ;;  %s1371_s1 = inlined_call_operand.hbm [shape: bf16[384,128], index: 1, kind: input, shape index: {}]   ;;  %s1372_s2 = inlined_call_operand.vmem [shape: f32[1,128], index: 2, kind: input, shape index: {}]   ;;  %s1373_s3 = inlined_call_operand.hbm [shape: bf16[384,128], index: 3, kind: input, shape index: {}]   ;;  %s1374_s4 = inlined_call_operand.vmem [shape: f32[1,128], index: 4, kind: input, shape index: {}]   ;;  %s1375_s5 = inlined_call_operand.hbm [shape: f32[2,16,128], index: 5, kind: output, shape index: {}]  }
   0x1   :  { %11 = vsyncpa [#allocation6], 0 }
   0x2   :  { %12 = vsyncpa [#allocation4], 0  ;;  %s1171_s18 = smov [#allocation5]   ;;  %s1077_s22 = scalar_lea.hbm %s1371_s1, 3072 }
   0x3   :  { %s30_s19 = sshll.u32 %s1171_s18, 4  ;;  %p1078_p0 = scmp.ne.s32.totalorder %s1371_s1, %s1077_s22  ;;  %s31_s19 = int_to_ptr.vmem [resolvable:$true] %s30_s19 }
   0x4   :  { %p1081_p1 = scmp.lt.u32.totalorder %s1077_s22, %s1371_s1 }
   0x6   :  { %p1083_p2 = pnand %p1081_p1, %p1078_p0 }
   0x8   :  { %1086 = shalt.err (!%p1083_p2)
}
   0x9   :  { %s1087_s27 = scalar_lea.vmem %s31_s19, 3072  ;;  %p1092_p4 = scmp.lt.s32.totalorder %s31_s19, %s31_s19 }
   0xa   :  { %p1088_p3 = scmp.ne.s32.totalorder %s31_s19, %s1087_s27  ;;  %p1093_p5 = scmp.lt.s32.totalorder %s1087_s27, %s1087_s27 }
   0xc   :  { %p1094_p6 = por %p1093_p5, %p1092_p4 }
   0xe   :  { %p1095_p7 = pnand %p1094_p6, %p1088_p3 }
  0x10   :  { %1098 = shalt.err (!%p1095_p7)
}
  0x11   :  { %s1172_s28 = smov 64   ;;  %s1173_s29 = smov 4  }
  0x12   :  { %36 = dma.hbm_to_vmem [thread:$0]  %s1371_s1, 3072, %s31_s19, [#allocation6], %s1172_s28, %s1172_s28, %s1173_s29  }
  0x13   :  { %s1174_s7 = smov [#allocation2]   ;;  %s1099_s11 = scalar_lea.hbm %s1370_s0, 512 }
  0x14   :  { %s18_s8 = sshll.u32 %s1174_s7, 4  ;;  %p1100_p8 = scmp.ne.s32.totalorder %s1370_s0, %s1099_s11  ;;  %s19_s8 = int_to_ptr.vmem [resolvable:$true] %s18_s8 }
  0x15   :  { %p1103_p9 = scmp.lt.u32.totalorder %s1099_s11, %s1370_s0 }
  0x17   :  { %p1105_p10 = pnand %p1103_p9, %p1100_p8 }
  0x19   :  { %1108 = shalt.err (!%p1105_p10)
}
  0x1a   :  { %s1109_s16 = scalar_lea.vmem %s19_s8, 512  ;;  %p1114_p12 = scmp.lt.s32.totalorder %s19_s8, %s19_s8 }
  0x1b   :  { %p1110_p11 = scmp.ne.s32.totalorder %s19_s8, %s1109_s16  ;;  %p1115_p13 = scmp.lt.s32.totalorder %s1109_s16, %s1109_s16 }
  0x1d   :  { %p1116_p0 = por %p1115_p13, %p1114_p12 }
  0x1f   :  { %p1117_p1 = pnand %p1116_p0, %p1110_p11 }
  0x21   :  { %1120 = shalt.err (!%p1117_p1)
}
  0x22   :  { %s1175_s1 = smov 128   ;;  %s1176_s17 = smov 8  }
  0x23   :  { %24 = dma.hbm_to_vmem [thread:$0]  %s1370_s0, 512, %s19_s8, [#allocation3], %s1175_s1, %s1175_s1, %s1176_s17  }
  0x24   :  { %s1177_s20 = smov [#allocation7]   ;;  %s1121_s24 = scalar_lea.hbm %s1373_s3, 3072 }
  0x25   :  { %s44_s21 = sshll.u32 %s1177_s20, 4  ;;  %p1122_p2 = scmp.ne.s32.totalorder %s1373_s3, %s1121_s24  ;;  %s45_s21 = int_to_ptr.vmem [resolvable:$true] %s44_s21 }
  0x26   :  { %p1125_p3 = scmp.lt.u32.totalorder %s1121_s24, %s1373_s3 }
  0x28   :  { %p1127_p4 = pnand %p1125_p3, %p1122_p2 }
  0x2a   :  { %1130 = shalt.err (!%p1127_p4)
}
  0x2b   :  { %s1131_s6 = scalar_lea.vmem %s45_s21, 3072  ;;  %p1136_p6 = scmp.lt.s32.totalorder %s45_s21, %s45_s21 }
  0x2c   :  { %p1132_p5 = scmp.ne.s32.totalorder %s45_s21, %s1131_s6  ;;  %p1137_p7 = scmp.lt.s32.totalorder %s1131_s6, %s1131_s6 }
  0x2e   :  { %p1138_p8 = por %p1137_p7, %p1136_p6 }
  0x30   :  { %p1139_p9 = pnand %p1138_p8, %p1132_p5 }
  0x32   :  { %1142 = shalt.err (!%p1139_p9)
}
  0x33   :  { %50 = dma.hbm_to_vmem [thread:$0]  %s1373_s3, 3072, %s45_s21, [#allocation6], %s1172_s28, %s1172_s28, %s1173_s29  }
  0x34   :  { %1165 = dma.done.wait [#allocation3], 512  }
  0x35   :  { %1166 = vsyncadd [#allocation3], 4294966784 }
  0x36   :  { %1167 = dma.done.wait [#allocation6], 6144  }
  0x37   :  { %1168 = vsyncadd [#allocation6], 4294961152  ;;  %v1029_v0 = vld [vmem:[#allocation5 + $0x40] sm:$0xff]   ;;  %v1031_v2 = vld [vmem:[#allocation5 + $0x48] sm:$0xff]   ;;  %v63_v8 = vlaneseq  ;;  %vm1178_vm5 = vmmov 1  }
  0x38   :  { %v1030_v1 = vld [vmem:[#allocation5] sm:$0xff]   ;;  %904 = vmatprep.subr.bf16.mxu0 %v1029_v0  ;;  %v1033_v4 = vld [vmem:[#allocation5 + $0x8] sm:$0xff]   ;;  %v1034_v5 = vld [vmem:[#allocation5 + $0x50] sm:$0xff]  }
  0x39   :  { %905 = vmatpush3.bf16.msra.mxu0 %v1030_v1  ;;  %v1032_v3 = vld [vmem:[#allocation5 + $0x80] sm:$0xff]   ;;  %v1035_v6 = vld [vmem:[#allocation5 + $0x88] sm:$0xff]   ;;  %v1036_v7 = vld [vmem:[#allocation5 + $0x10] sm:$0xff]   ;;  %v1255_v13 = vshrl.u32 %v63_v8, 7 }
  0x3a   :  { %906 = vmatprep.subr.bf16.mxu0 %v1031_v2  ;;  %980 = vmatprep.subr.bf16.mxu1 %v1032_v3  ;;  %v1037_v9 = vld [vmem:[#allocation5 + $0x58] sm:$0xff]   ;;  %v1038_v10 = vld [vmem:[#allocation5 + $0x90] sm:$0xff]   ;;  %v1040_v12 = vld [vmem:[#allocation5 + $0x60] sm:$0xff]  }
  0x3b   :  { %981 = vmatpush3.bf16.msra.mxu1 %v1032_v3  ;;  %v1039_v11 = vld [vmem:[#allocation5 + $0x18] sm:$0xff]   ;;  %v1042_v15 = vld [vmem:[#allocation5 + $0x20] sm:$0xff]   ;;  %v65_v17 = vadd.s32 8, %v1255_v13  ;;  %v1043_v18 = vld [vmem:[#allocation5 + $0x68] sm:$0xff]   ;;  %v72_v19 = vand.u32 15, %v1255_v13  ;;  %v67_v20 = vadd.s32 24, %v1255_v13 }
  0x3c   :  { %982 = vmatprep.subr.bf16.mxu1 %v1035_v6  ;;  %v1041_v14 = vld [vmem:[#allocation5 + $0x98] sm:$0xff]   ;;  %v1044_v16 = vld [vmem:[#allocation5 + $0xa0] sm:$0xff]   ;;  %v1045_v21 = vld [vmem:[#allocation5 + $0x28] sm:$0xff]   ;;  %v66_v22 = vadd.s32 16, %v1255_v13  ;;  %vm132_vm0 = vcmp.lt.s32.totalorder %v1255_v13, 1  ;;  %vm153_vm1 = vcmp.lt.s32.totalorder %v1255_v13, 7 }
  0x3d   :  { %907 = vmatpush3.bf16.msra.mxu0 %v1033_v4  ;;  %v1047_v23 = vld [vmem:[#allocation5 + $0xa8] sm:$0xff]   ;;  %v79_v24 = vand.u32 15, %v65_v17  ;;  %v1046_v25 = vld [vmem:[#allocation5 + $0x70] sm:$0xff]   ;;  %v93_v27 = vand.u32 15, %v67_v20  ;;  %v1049_v28 = vld [vmem:[#allocation5 + $0x78] sm:$0xff]   ;;  %vm1263_vm2 = vcmp.ne.s32.totalorder %v72_v19, 0 }
  0x3e   :  { %908 = vmatprep.subr.bf16.mxu0 %v1034_v5  ;;  %v1048_v26 = vld [vmem:[#allocation5 + $0x30] sm:$0xff]   ;;  %v124_v30 = vld [vmem:[#allocation2] sm:$0xff]  ;;  %v125_v31 = vld [vmem:[#allocation2 + $0x8] sm:$0xff]  ;;  %v86_v35 = vand.u32 15, %v66_v22 }
  0x3f   :  { %983 = vmatpush3.bf16.msra.mxu1 %v1035_v6  ;;  %v1050_v29 = vld [vmem:[#allocation5 + $0xb0] sm:$0xff]   ;;  %v127_v33 = vld [vmem:[#allocation2 + $0x18] sm:$0xff]  ;;  %vm1267_vm3 = vcmp.ne.s32.totalorder %v79_v24, 15  ;;  %v128_v36 = vrot.slane %v124_v30, 7  ;;  %v129_v37 = vrot.slane %v125_v31, 7  ;;  %v149_v38 = vrot.slane %v124_v30, 1  ;;  %vm1284_vm6 = vmpackc.low %vm1178_vm5, %vm1263_vm2 }
  0x40   :  { %984 = vmatprep.subr.bf16.mxu1 %v1038_v10  ;;  %v150_v39 = vrot.slane %v125_v31, 1  ;;  %v1051_v40 = vld [vmem:[#allocation5 + $0x38] sm:$0xff]   ;;  %v171_v41 = vpack.c.bf16 %v125_v31, %v124_v30  ;;  %v131_v42 = vrot.slane %v127_v33, 7  ;;  %v126_v43 = vld [vmem:[#allocation2 + $0x10] sm:$0xff]  ;;  %vm1271_vm4 = vcmp.ne.s32.totalorder %v93_v27, 15  ;;  %vm1293_vm7 = vmpackc.low %vm1267_vm3, %vm1178_vm5 }
  0x41   :  { %909 = vmatpush3.bf16.msra.mxu0 %v1036_v7  ;;  %v151_v45 = vrot.slane %v126_v43, 1  ;;  %v152_v47 = vrot.slane %v127_v33, 1  ;;  %v135_v48 = vsel %vm132_vm0, %v128_v36, %v129_v37  ;;  %v1052_v51 = vld [vmem:[#allocation5 + $0xb8] sm:$0xff]   ;;  %vm118_vm8 = vcmp.ne.s32.totalorder %v86_v35, 0  ;;  %v1053_v54 = vld [vmem:[#allocation7 + $0x40] sm:$0xff]   ;;  %vm1300_vm9 = vmpackc.low %vm1271_vm4, %vm1178_vm5 }
  0x42   :  { %910 = vmatprep.subr.bf16.mxu0 %v1037_v9  ;;  %v156_v46 = vsel %vm153_vm1, %v149_v38, %v150_v39  ;;  %v136_v49 = vsel %vm132_vm0, %v131_v42, %v128_v36  ;;  %407 = vmatprep.mubr.bf16.mxu0 %v171_v41  ;;  %v1054_v60 = vld [vmem:[#allocation7 + $0x80] sm:$0xff]   ;;  %v130_v61 = vrot.slane %v126_v43, 7  ;;  %v174_v62 = vpack.c.bf16 %v127_v33, %v126_v43  ;;  %vm1309_vm10 = vmpackc.low %vm1178_vm5, %vm118_vm8  ;;  %v1056_v1 = vld [vmem:[#allocation7 + $0x48] sm:$0xff]  }
  0x43   :  { %985 = vmatpush3.bf16.msra.mxu1 %v1038_v10  ;;  %v155_v52 = vsel %vm153_vm1, %v150_v39, %v151_v45  ;;  %v856_v57 = vpack.c.bf16 %v135_v48, %v136_v49  ;;  %v154_v58 = vsel %vm153_vm1, %v151_v45, %v152_v47  ;;  %v157_v59 = vsel %vm153_vm1, %v152_v47, %v149_v38  ;;  %v1055_v0 = vld [vmem:[#allocation7] sm:$0xff]   ;;  %v1057_v3 = vld [vmem:[#allocation7 + $0x88] sm:$0xff]   ;;  %v1059_v8 = vld [vmem:[#allocation7 + $0x50] sm:$0xff]  }
  0x44   :  { %986 = vmatprep.subr.bf16.mxu1 %v1041_v14  ;;  %v862_v55 = vpack.c.bf16 %v155_v52, %v156_v46  ;;  %v865_v2 = vpack.c.bf16 %v157_v59, %v154_v58  ;;  %v1058_v4 = vld [vmem:[#allocation7 + $0x8] sm:$0xff]   ;;  %v133_v5 = vsel %vm132_vm0, %v130_v61, %v131_v42  ;;  %v134_v6 = vsel %vm132_vm0, %v129_v37, %v130_v61  ;;  %v1060_v9 = vld [vmem:[#allocation7 + $0x90] sm:$0xff]   ;;  %v1067_v17 = vld [vmem:[#allocation7 + $0x20] sm:$0xff]  }
  0x45   :  { %911 = vmatpush3.bf16.msra.mxu0 %v1039_v11  ;;  %v859_v7 = vpack.c.bf16 %v133_v5, %v134_v6  ;;  %v1061_v10 = vld [vmem:[#allocation7 + $0x10] sm:$0xff]   ;;  %v1062_v11 = vld [vmem:[#allocation7 + $0x58] sm:$0xff]   ;;  %v1069_v19 = vld [vmem:[#allocation7 + $0xa8] sm:$0xff]  }
  0x46   :  { %912 = vmatprep.subr.bf16.mxu0 %v1040_v12  ;;  %996 = vmatprep.mubr.msk.bf16.mxu1 %vm1293_vm7, %v862_v55  ;;  %v1063_v12 = vld [vmem:[#allocation7 + $0x98] sm:$0xff]   ;;  %v1070_v20 = vld [vmem:[#allocation7 + $0x28] sm:$0xff]   ;;  %v1072_v22 = vld [vmem:[#allocation7 + $0xb0] sm:$0xff]  }
  0x47   :  { %987 = vmatpush3.bf16.msra.mxu1 %v1041_v14  ;;  %v1064_v14 = vld [vmem:[#allocation7 + $0x18] sm:$0xff]   ;;  %v867_v53 = vld [vmem:[%s1374_s4] ss:$0 sm:$0xff]  ;;  %s1179_s4 = smov [#allocation8]  }
  0x48   :  { %988 = vmatprep.subr.bf16.mxu1 %v1044_v16  ;;  %v1074_v24 = vld [vmem:[#allocation7 + $0x78] sm:$0xff]   ;;  %s817_s8 = sshll.u32 %s1179_s4, 4  ;;  %s818_s8 = int_to_ptr.vmem [resolvable:$true] %s817_s8 }
  0x49   :  { %913 = vmatpush3.bf16.msra.mxu0 %v1042_v15  ;;  %v1065_v15 = vld [vmem:[#allocation7 + $0x60] sm:$0xff]   ;;  %s1143_s9 = scalar_lea.vmem %s818_s8, 512  ;;  %p1148_p11 = scmp.lt.s32.totalorder %s818_s8, %s818_s8 }
  0x4a   :  { %914 = vmatprep.subr.bf16.mxu0 %v1043_v18  ;;  %v1068_v18 = vld [vmem:[#allocation7 + $0x68] sm:$0xff]   ;;  %p1144_p10 = scmp.ne.s32.totalorder %s818_s8, %s1143_s9  ;;  %p1149_p12 = scmp.lt.s32.totalorder %s1143_s9, %s1143_s9 }
  0x4b   :  { %989 = vmatpush3.bf16.msra.mxu1 %v1044_v16  ;;  %v1066_v16 = vld [vmem:[#allocation7 + $0xa0] sm:$0xff]  }
  0x4c   :  { %990 = vmatprep.subr.bf16.mxu1 %v1047_v23  ;;  %p1150_p13 = por %p1149_p12, %p1148_p11 }
  0x4d   :  { %915 = vmatpush3.bf16.msra.mxu0 %v1045_v21  ;;  %v1071_v21 = vld [vmem:[#allocation7 + $0x70] sm:$0xff]  }
  0x4e   :  { %916 = vmatprep.subr.bf16.mxu0 %v1046_v25  ;;  %v1075_v25 = vld [vmem:[#allocation7 + $0xb8] sm:$0xff]   ;;  %p1151_p0 = pnand %p1150_p13, %p1144_p10 }
  0x4f   :  { %991 = vmatpush3.bf16.msra.mxu1 %v1047_v23  ;;  %v1073_v23 = vld [vmem:[#allocation7 + $0x30] sm:$0xff]  }
  0x50   :  { %992 = vmatprep.subr.bf16.mxu1 %v1050_v29 }
  0x51   :  { %917 = vmatpush3.bf16.msra.mxu0 %v1048_v26  ;;  %v1076_v26 = vld [vmem:[#allocation7 + $0x38] sm:$0xff]  }
  0x52   :  { %918 = vmatprep.subr.bf16.mxu0 %v1049_v28 }
  0x53   :  { %993 = vmatpush3.bf16.msra.mxu1 %v1050_v29  ;;  %v830_v29 = vld [vmem:[%s1372_s2] ss:$0 sm:$0xff] }
  0x54   :  { %994 = vmatprep.subr.bf16.mxu1 %v1052_v51 }
  0x55   :  { %919 = vmatpush3.bf16.msra.mxu0 %v1051_v40 }
  0x56   :  { %942 = vmatprep.subr.bf16.mxu0 %v1053_v54 }
  0x57   :  { %995 = vmatpush3.bf16.msra.mxu1 %v1052_v51 }
  0x58   :  { %857 = vmatmul.mubr.msk.bf16.vlgmr.msra.gmra.mrb[0].mxu0 %vm1284_vm6, %v856_v57  ;;  %1000 = vmatprep.subr.bf16.mxu1 %v1054_v60 }
  0x59   :  { %415 = vmatprep.mubr.bf16.mxu0 %v174_v62  ;;  %943 = vmatpush3.bf16.msra.mxu0 %v1055_v0 }
  0x5a   :  { %997 = vmatmul.mubr.msk.bf16.vlgmr.msra.gmra.mrb[0].mxu1 %vm1300_vm9, %v865_v2  ;;  %944 = vmatprep.subr.bf16.mxu0 %v1056_v1 }
  0x5b   :  { %1001 = vmatpush3.bf16.msra.mxu1 %v1054_v60 }
  0x5c   :  { %1002 = vmatprep.subr.bf16.mxu1 %v1057_v3 }
  0x5d   :  { %945 = vmatpush3.bf16.msra.mxu0 %v1058_v4 }
  0x5e   :  { %946 = vmatprep.subr.bf16.mxu0 %v1059_v8 }
  0x5f   :  { %1003 = vmatpush3.bf16.msra.mxu1 %v1057_v3 }
  0x60   :  { %860 = vmatmul.mubr.msk.bf16.gmra.mrb[4].mxu0 %vm1309_vm10, %v859_v7  ;;  %1004 = vmatprep.subr.bf16.mxu1 %v1060_v9 }
  0x61   :  { %947 = vmatpush3.bf16.msra.mxu0 %v1061_v10 }
  0x62   :  { %948 = vmatprep.subr.bf16.mxu0 %v1062_v11 }
  0x63   :  { %1005 = vmatpush3.bf16.msra.mxu1 %v1060_v9 }
  0x64   :  { %1006 = vmatprep.subr.bf16.mxu1 %v1063_v12 }
  0x65   :  { %949 = vmatpush3.bf16.msra.mxu0 %v1064_v14 }
  0x66   :  { %950 = vmatprep.subr.bf16.mxu0 %v1065_v15 }
  0x67   :  { %1007 = vmatpush3.bf16.msra.mxu1 %v1063_v12 }
  0x68   :  { %1008 = vmatprep.subr.bf16.mxu1 %v1066_v16 }
  0x69   :  { %951 = vmatpush3.bf16.msra.mxu0 %v1067_v17 }
  0x6a   :  { %952 = vmatprep.subr.bf16.mxu0 %v1068_v18 }
  0x6b   :  { %1009 = vmatpush3.bf16.msra.mxu1 %v1066_v16 }
  0x6c   :  { %1010 = vmatprep.subr.bf16.mxu1 %v1069_v19 }
  0x6d   :  { %953 = vmatpush3.bf16.msra.mxu0 %v1070_v20 }
  0x6e   :  { %954 = vmatprep.subr.bf16.mxu0 %v1071_v21 }
  0x6f   :  { %1011 = vmatpush3.bf16.msra.mxu1 %v1069_v19 }
  0x70   :  { %1012 = vmatprep.subr.bf16.mxu1 %v1072_v22 }
  0x71   :  { %955 = vmatpush3.bf16.msra.mxu0 %v1073_v23 }
  0x72   :  { %956 = vmatprep.subr.bf16.mxu0 %v1074_v24 }
  0x73   :  { %1013 = vmatpush3.bf16.msra.mxu1 %v1072_v22 }
  0x74   :  { %1014 = vmatprep.subr.bf16.mxu1 %v1075_v25 }
  0x75   :  { %957 = vmatpush3.bf16.msra.mxu0 %v1076_v26 }
  0x77   :  { %1015 = vmatpush3.bf16.msra.mxu1 %v1075_v25 }
 0x12b   :  { %v920_v27 = vpop.f32.mrb[0].mxu0 }
 0x12c   :  { %v921_v28 = vpop.f32.mrb[1].mxu0 }
 0x12d   :  { %v922_v30 = vadd.f32 %v921_v28, %v920_v27  ;;  %v923_v31 = vpop.f32.mrb[2].mxu0  ;;  %v998_v33 = vpop.f32.mrb[0].mxu1 }
 0x12e   :  { %v924_v32 = vpop.f32.mrb[3].mxu0  ;;  %v458_v36 = vpop.f32.mrb[1].mxu1 }
 0x12f   :  { %v925_v34 = vadd.f32 %v924_v32, %v923_v31  ;;  %v410_v35 = vadd.f32 %v922_v30, %v830_v29  ;;  %v999_v37 = vpop.f32.mrb[2].mxu1 }
 0x130   :  { %v461_v40 = vpop.f32.mrb[3].mxu1 }
 0x131   :  { %v459_v38 = vadd.f32 %v458_v36, %v410_v35  ;;  %v413_v39 = vadd.f32 %v925_v34, %v830_v29 }
 0x133   :  { %v473_v41 = vmax.f32 %v459_v38, 0.0  ;;  %v462_v42 = vadd.f32 %v461_v40, %v413_v39  ;;  %v926_v43 = vpop.f32.mrb[4].mxu0 }
 0x134   :  { %v927_v44 = vpop.f32.mrb[5].mxu0 }
 0x135   :  { %v474_v45 = vmax.f32 %v462_v42, 0.0  ;;  %v928_v46 = vadd.f32 %v927_v44, %v926_v43  ;;  %v929_v47 = vpop.f32.mrb[6].mxu0  ;;  %v477_v48 = vrot.slane %v473_v41, 7  ;;  %v489_v49 = vrot.slane %v473_v41, 1 }
 0x136   :  { %v930_v51 = vpop.f32.mrb[7].mxu0 }
 0x137   :  { %v478_v52 = vrot.slane %v474_v45, 7  ;;  %v490_v54 = vrot.slane %v474_v45, 1  ;;  %v418_v55 = vadd.f32 %v928_v46, %v830_v29  ;;  %v931_v57 = vadd.f32 %v930_v51, %v929_v47 }
 0x138   :  { %v502_v58 = vpack.c.bf16 %v474_v45, %v473_v41 }
 0x139   :  { %v483_v59 = vsel %vm132_vm0, %v477_v48, %v478_v52  ;;  %v467_v60 = vadd.f32 %v998_v33, %v418_v55  ;;  %v421_v61 = vadd.f32 %v931_v57, %v830_v29  ;;  %v495_v62 = vsel %vm153_vm1, %v489_v49, %v490_v54 }
 0x13a   :  { %738 = vmatprep.mubr.bf16.mxu0 %v502_v58 }
 0x13b   :  { %v475_v0 = vmax.f32 %v467_v60, 0.0  ;;  %v470_v1 = vadd.f32 %v999_v37, %v421_v61 }
 0x13d   :  { %v479_v2 = vrot.slane %v475_v0, 7  ;;  %v491_v3 = vrot.slane %v475_v0, 1  ;;  %v476_v4 = vmax.f32 %v470_v1, 0.0 }
 0x13f   :  { %v480_v5 = vrot.slane %v476_v4, 7  ;;  %v492_v6 = vrot.slane %v476_v4, 1  ;;  %v494_v7 = vsel %vm153_vm1, %v490_v54, %v491_v3  ;;  %v505_v8 = vpack.c.bf16 %v476_v4, %v475_v0 }
 0x140   :  { %v899_v9 = vpack.c.bf16 %v494_v7, %v495_v62  ;;  %v482_v10 = vsel %vm132_vm0, %v478_v52, %v479_v2 }
 0x141   :  { %v484_v11 = vsel %vm132_vm0, %v480_v5, %v477_v48  ;;  %v493_v12 = vsel %vm153_vm1, %v491_v3, %v492_v6  ;;  %v496_v14 = vsel %vm153_vm1, %v492_v6, %v489_v49  ;;  %v481_v15 = vsel %vm132_vm0, %v479_v2, %v480_v5 }
 0x142   :  { %v893_v16 = vpack.c.bf16 %v483_v59, %v484_v11  ;;  %1016 = vmatprep.mubr.msk.bf16.mxu1 %vm1293_vm7, %v899_v9  ;;  %v902_v17 = vpack.c.bf16 %v496_v14, %v493_v12  ;;  %v896_v18 = vpack.c.bf16 %v481_v15, %v482_v10 }
 0x144   :  { %894 = vmatmul.mubr.msk.bf16.vlgmr.msra.gmra.mrb[8].mxu0 %vm1284_vm6, %v893_v16  ;;  %1017 = vmatmul.mubr.msk.bf16.vlgmr.msra.gmra.mrb[4].mxu1 %vm1300_vm9, %v902_v17 }
 0x145   :  { %746 = vmatprep.mubr.bf16.mxu0 %v505_v8 }
 0x14c   :  { %897 = vmatmul.mubr.msk.bf16.gmra.mrb[12].mxu0 %vm1309_vm10, %v896_v18 }
 0x217   :  { %v958_v19 = vpop.f32.mrb[8].mxu0  ;;  %v1018_v20 = vpop.f32.mrb[4].mxu1 }
 0x218   :  { %v959_v13 = vpop.f32.mrb[9].mxu0  ;;  %v789_v21 = vpop.f32.mrb[5].mxu1 }
 0x219   :  { %v960_v22 = vadd.f32 %v959_v13, %v958_v19  ;;  %v961_v23 = vpop.f32.mrb[10].mxu0  ;;  %v1019_v24 = vpop.f32.mrb[6].mxu1 }
 0x21a   :  { %v962_v50 = vpop.f32.mrb[11].mxu0  ;;  %v792_v25 = vpop.f32.mrb[7].mxu1 }
 0x21b   :  { %v741_v26 = vadd.f32 %v960_v22, %v867_v53  ;;  %v963_v56 = vadd.f32 %v962_v50, %v961_v23 }
 0x21d   :  { %v790_v27 = vadd.f32 %v789_v21, %v741_v26  ;;  %v744_v28 = vadd.f32 %v963_v56, %v867_v53 }
 0x21f   :  { %v804_v29 = vmax.f32 %v790_v27, 0.0  ;;  %v793_v63 = vadd.f32 %v792_v25, %v744_v28  ;;  %v964_v30 = vpop.f32.mrb[12].mxu0 }
 0x220   :  { %v965_v31 = vpop.f32.mrb[13].mxu0 }
 0x221   :  { %808 = vst [vmem:[#allocation8] sm:$0xff] %v804_v29  ;;  %v805_v32 = vmax.f32 %v793_v63, 0.0  ;;  %v966_v33 = vadd.f32 %v965_v31, %v964_v30  ;;  %v967_v34 = vpop.f32.mrb[14].mxu0 }
 0x222   :  { %v968_v35 = vpop.f32.mrb[15].mxu0 }
 0x223   :  { %809 = vst [vmem:[#allocation8 + $0x8] sm:$0xff] %v805_v32  ;;  %v749_v36 = vadd.f32 %v966_v33, %v867_v53  ;;  %v969_v37 = vadd.f32 %v968_v35, %v967_v34 }
 0x225   :  { %v798_v38 = vadd.f32 %v1018_v20, %v749_v36  ;;  %v752_v39 = vadd.f32 %v969_v37, %v867_v53 }
 0x227   :  { %v806_v40 = vmax.f32 %v798_v38, 0.0  ;;  %v801_v41 = vadd.f32 %v1019_v24, %v752_v39 }
 0x229   :  { %810 = vst [vmem:[#allocation8 + $0x10] sm:$0xff] %v806_v40  ;;  %v807_v42 = vmax.f32 %v801_v41, 0.0 }
 0x22b   :  { %811 = vst [vmem:[#allocation8 + $0x18] sm:$0xff] %v807_v42 }
 0x22c   :  { %1154 = shalt.err (!%p1151_p0)
}
 0x22d   :  { %s1155_s12 = scalar_lea.hbm %s1375_s5, 512 }
 0x22e   :  { %p1156_p1 = scmp.ne.s32.totalorder %s1375_s5, %s1155_s12  ;;  %p1159_p2 = scmp.lt.u32.totalorder %s1155_s12, %s1375_s5 }
 0x230   :  { %p1161_p3 = pnand %p1159_p2, %p1156_p1 }
 0x232   :  { %1164 = shalt.err (!%p1161_p3)
}
 0x233   :  { %823 = dma.vmem_to_hbm [thread:$0]  %s818_s8, 512, %s1375_s5, [#allocation4], %s1175_s1, %s1175_s1, %s1176_s17  }
 0x234   :  { %1169 = dma.done.wait [#allocation4], 512  }
 0x235   :  { %1170 = vsyncadd [#allocation4], 4294966784 }
 0x236   :  { %827 = vsyncpa [#allocation3], 1 }
 0x237   :  { %828 = vsyncpa [#allocation6], 1 }
 0x238   :  { %829 = vsyncpa [#allocation4], 1 }

</bundles_post_ra>
